<compile_context>
chip_gen: v7x
topology: tpu7x:2x2x1
jax: 0.10.0
libtpu: 0.0.40
codegen_flags: <defaults>
</compile_context>

<pallas_src>
import functools

import jax
import jax.numpy as jnp
from jax.experimental import pallas as pl
from jax.experimental.pallas import tpu as pltpu

LANES = 128
SUBLANES = 8
MAX_TILE_ROWS = 8192                   # 8192 * 128 * 4B = 4 MiB per f32 stream block
VMEM_DATA_BUDGET = 24 * 1024 * 1024    # double-buffered input blocks budget
VMEM_LIMIT_BYTES = 32 * 1024 * 1024    # explicit scoped-VMEM (safe on v5e/v6e/v7x)


def _accumulate(pred_refs, gt_ref, inter_ref, psum_ref, gsum_ref, *,
                sub, limit_rows=None):
    """Add this block's partial sums into the resident (8, 128) accumulators."""
    tile_rows = sub * SUBLANES
    valid = None
    g = gt_ref[...].astype(jnp.float32)
    if limit_rows is not None:
        # Masking path: only emitted (and only executed) for the ragged last
        # block.  Zeroing both operands keeps garbage rows (even NaN) out.
        row_ids = jax.lax.broadcasted_iota(jnp.int32, (tile_rows, LANES), 0)
        valid = row_ids < limit_rows
        g = jnp.where(valid, g, jnp.float32(0.0))
    gsum_ref[...] += g.reshape(sub, SUBLANES, LANES).sum(axis=0)
    for k, pref in enumerate(pred_refs):
        p = pref[...].astype(jnp.float32)
        if valid is not None:
            p = jnp.where(valid, p, jnp.float32(0.0))
        inter_ref[k] += (p * g).reshape(sub, SUBLANES, LANES).sum(axis=0)
        psum_ref[k] += p.reshape(sub, SUBLANES, LANES).sum(axis=0)


def _soft_iou_kernel(*refs, n_preds, tile_rows, grid_len, rows_in_last,
                     steps_per_core):
    pred_refs = refs[:n_preds]
    gt_ref = refs[n_preds]
    inter_ref = refs[n_preds + 1]    # (n_preds, 8, 128) per-core partials
    psum_ref = refs[n_preds + 2]     # (n_preds, 8, 128)
    gsum_ref = refs[n_preds + 3]     # (8, 128)

    c = pl.program_id(0)             # parallel axis (TensorCore split on v7x)
    i = pl.program_id(1)             # reduction axis (per core)
    b = c * steps_per_core + i       # global row-block index

    @pl.when(i == 0)                 # first reduction step of *each* core
    def _init():
        inter_ref[...] = jnp.zeros_like(inter_ref)
        psum_ref[...] = jnp.zeros_like(psum_ref)
        gsum_ref[...] = jnp.zeros_like(gsum_ref)

    sub = tile_rows // SUBLANES
    acc = functools.partial(_accumulate, pred_refs, gt_ref, inter_ref,
                            psum_ref, gsum_ref, sub=sub)

    ragged = rows_in_last != tile_rows          # static
    padded_grid = 2 * steps_per_core > grid_len  # static (odd grid_len)

    if ragged:
        @pl.when(b < grid_len - 1)
        def _full():
            acc()                                # unmasked fast path

        @pl.when(b == grid_len - 1)
        def _last():
            acc(limit_rows=rows_in_last)         # masked, last block only
    elif padded_grid:
        @pl.when(b < grid_len)
        def _full():
            acc()
    else:
        acc()


def _prepare(x):
    """Flatten to a lane-dense (rows, 128) slab with rows a multiple of 8."""
    flat = x.reshape(-1)
    n = flat.size
    chunk = SUBLANES * LANES
    rem = n % chunk
    if rem:
        # Rare fallback; zero padding is sum-neutral for every accumulator.
        flat = jnp.pad(flat, (0, chunk - rem))
    return flat.reshape(-1, LANES)


def _soft_iou_losses(preds, gt, *, max_tile_rows=MAX_TILE_ROWS):
    """Per-prediction Soft-IoU losses, shape (len(preds),), f32.

    Inputs may be any float dtype (bf16 welcome; the kernel widens to f32 at
    load) — do NOT pre-cast to f32.  gt is streamed once for all predictions.
    """
    # TODO(synk): support broadcasting gt against preds (PyTorch semantics);
    #             here identical shapes are required.
    for p in preds:
        assert p.shape == gt.shape, (p.shape, gt.shape)

    pred2d = [_prepare(p) for p in preds]
    gt2d = _prepare(gt)
    rows = gt2d.shape[0]
    n_preds = len(pred2d)

    # Tile sizing: biggest block keeping 2x-buffered streams under budget.
    bytes_per_row = LANES * (sum(p.dtype.itemsize for p in pred2d)
                             + gt2d.dtype.itemsize)
    budget_rows = max(SUBLANES, VMEM_DATA_BUDGET // (2 * bytes_per_row))
    tile_rows = min(max_tile_rows, budget_rows)
    tile_rows = max(SUBLANES, (tile_rows // SUBLANES) * SUBLANES)
    if rows <= tile_rows:
        tile_rows = rows                      # single full block per stream

    grid_len = pl.cdiv(rows, tile_rows)
    rows_in_last = rows - (grid_len - 1) * tile_rows
    steps_per_core = pl.cdiv(grid_len, 2)     # split reduction across 2 TCs

    if 2 * steps_per_core == grid_len:
        def in_index(c, i):
            return (c * steps_per_core + i, 0)
    else:
        # Clamp the (at most one) padded step; the kernel skips its contribution.
        def in_index(c, i):
            return (jnp.minimum(c * steps_per_core + i, grid_len - 1), 0)

    kernel = functools.partial(
        _soft_iou_kernel, n_preds=n_preds, tile_rows=tile_rows,
        grid_len=grid_len, rows_in_last=rows_in_last,
        steps_per_core=steps_per_core)

    in_spec = pl.BlockSpec((tile_rows, LANES), in_index)

    inter_p, psum_p, gsum_p = pl.pallas_call(
        kernel,
        out_shape=(
            jax.ShapeDtypeStruct((2, n_preds, SUBLANES, LANES), jnp.float32),
            jax.ShapeDtypeStruct((2, n_preds, SUBLANES, LANES), jnp.float32),
            jax.ShapeDtypeStruct((2, SUBLANES, LANES), jnp.float32),
        ),
        grid_spec=pltpu.PrefetchScalarGridSpec(
            num_scalar_prefetch=0,
            grid=(2, steps_per_core),
            in_specs=[in_spec] * (n_preds + 1),
            out_specs=[
                pl.BlockSpec((None, n_preds, SUBLANES, LANES),
                             lambda c, i: (c, 0, 0, 0)),
                pl.BlockSpec((None, n_preds, SUBLANES, LANES),
                             lambda c, i: (c, 0, 0, 0)),
                pl.BlockSpec((None, SUBLANES, LANES),
                             lambda c, i: (c, 0, 0)),
            ],
        ),
        compiler_params=pltpu.CompilerParams(
            dimension_semantics=("parallel", "arbitrary"),
            vmem_limit_bytes=VMEM_LIMIT_BYTES,
        ),
    )(*pred2d, gt2d)

    # Final scalar math in plain JAX (cheap; keeps the kernel epilogue trivial).
    inter = inter_p.sum(axis=(0, 2, 3))   # (n_preds,)
    psum = psum_p.sum(axis=(0, 2, 3))     # (n_preds,)
    gsum = gsum_p.sum()                   # scalar: gt.sum()
    smooth = jnp.float32(1.0)
    return jnp.float32(1.0) - (inter + smooth) / (psum + gsum - inter + smooth)


def soft_iou_loss(preds, gt_masks, *, max_tile_rows=MAX_TILE_ROWS):
    """JAX/Pallas equivalent of SoftIoULoss.forward."""
    if isinstance(preds, (list, tuple)):
        losses = _soft_iou_losses(list(preds), gt_masks,
                                  max_tile_rows=max_tile_rows)
        return losses.sum() / jnp.float32(len(preds))
    return _soft_iou_losses([preds], gt_masks, max_tile_rows=max_tile_rows)[0]


def _ref_loss(pred, gt):
    pred = pred.astype(jnp.float32)
    gt = gt.astype(jnp.float32)
    inter = jnp.sum(pred * gt)
    return 1.0 - (inter + 1.0) / (jnp.sum(pred) + jnp.sum(gt) - inter + 1.0)


if __name__ == "__main__":
    key = jax.random.PRNGKey(0)
    k1, k2, k3, k4, k5 = jax.random.split(key, 5)

    # Small NCHW case (single-block path, grid=(2,1), core-1 step skipped).
    B, C, H, W = 2, 4, 16, 16
    preds = jax.nn.sigmoid(jax.random.normal(k1, (B, C, H, W), dtype=jnp.float32))
    gt = (jax.random.uniform(k2, (B, C, H, W)) > 0.7).astype(jnp.float32)

    loss = jax.block_until_ready(soft_iou_loss(preds, gt))
    ref = _ref_loss(preds, gt)
    assert jnp.allclose(loss, ref, rtol=1e-5, atol=1e-5), (loss, ref)

    # List/tuple branch: one fused pallas_call sharing the gt stream.
    preds2 = jax.nn.sigmoid(jax.random.normal(k3, (B, C, H, W), dtype=jnp.float32))
    loss_list = jax.block_until_ready(soft_iou_loss([preds, preds2], gt))
    ref_list = (ref + _ref_loss(preds2, gt)) / 2.0
    assert jnp.allclose(loss_list, ref_list, rtol=1e-5, atol=1e-5), (loss_list, ref_list)

    # Mid-size case exercising the multi-block grid, the ragged-tail masked
    # branch, and the odd-grid padded-step skip: 1*1*514*512 = 263168 elems ->
    # 2056 rows; max_tile_rows=512 -> grid_len=5, last block has 8 valid rows.
    shape2 = (1, 1, 514, 512)
    preds3 = jax.nn.sigmoid(jax.random.normal(k4, shape2, dtype=jnp.float32))
    gt3 = (jax.random.uniform(k5, shape2) > 0.7).astype(jnp.float32)
    loss3 = jax.block_until_ready(soft_iou_loss(preds3, gt3, max_tile_rows=512))
    ref3 = _ref_loss(preds3, gt3)
    assert jnp.allclose(loss3, ref3, rtol=1e-4, atol=1e-5), (loss3, ref3)

    # bf16 prediction stream (half the HBM bytes); gt stays f32.
    preds_bf16 = preds.astype(jnp.bfloat16)
    loss_bf16 = jax.block_until_ready(soft_iou_loss(preds_bf16, gt))
    ref_bf16 = _ref_loss(preds_bf16, gt)
    assert jnp.allclose(loss_bf16, ref_bf16, rtol=1e-4, atol=1e-5), (loss_bf16, ref_bf16)

    print("KERNEL_OK")
</pallas_src>

<mosaic_0001>
module attributes {stable_mosaic.version = 11 : i64} {
  func.func @_soft_iou_kernel(%arg0: i32, %arg1: i32, %arg2: memref<16x128xf32, #tpu.memory_space<vmem>>, %arg3: memref<16x128xf32, #tpu.memory_space<vmem>>, %arg4: memref<1x1x8x128xf32, #tpu.memory_space<vmem>>, %arg5: memref<1x1x8x128xf32, #tpu.memory_space<vmem>>, %arg6: memref<1x8x128xf32, #tpu.memory_space<vmem>>) attributes {dimension_semantics = [#tpu.dimension_semantics<parallel>, #tpu.dimension_semantics<arbitrary>], iteration_bounds = array<i64: 2, 1>, scalar_prefetch = 0 : i64, scratch_operands = 0 : i64, tpu.core_type = #tpu.core_type<tc>, window_params = [{transform_indices = @transform_0, window_bounds = array<i64: 16, 128>}, {transform_indices = @transform_1, window_bounds = array<i64: 16, 128>}, {transform_indices = @transform_2, window_bounds = array<i64: 1, 1, 8, 128>}, {transform_indices = @transform_3, window_bounds = array<i64: 1, 1, 8, 128>}, {transform_indices = @transform_4, window_bounds = array<i64: 1, 8, 128>}]} {
    %c1_i32 = arith.constant 1 : i32
    %0 = arith.muli %arg0, %c1_i32 : i32
    %1 = arith.addi %0, %arg1 : i32
    %c0_i32 = arith.constant 0 : i32
    %2 = arith.cmpi eq, %arg1, %c0_i32 : i32
    %3 = arith.extui %2 : i1 to i32
    %c0_i32_0 = arith.constant 0 : i32
    %4 = arith.cmpi ne, %3, %c0_i32_0 : i32
    scf.if %4 {
      %cst = arith.constant 0.000000e+00 : f32
      %8 = vector.broadcast %cst : f32 to vector<1x8x128xf32>
      %c0 = arith.constant 0 : index
      %c0_3 = arith.constant 0 : index
      %c0_4 = arith.constant 0 : index
      %c0_5 = arith.constant 0 : index
      %9 = vector.load %arg4[%c0, %c0_3, %c0_4, %c0_5] : memref<1x1x8x128xf32, #tpu.memory_space<vmem>>, vector<1x1x8x128xf32>
      %10 = vector.shape_cast %9 : vector<1x1x8x128xf32> to vector<1x8x128xf32>
      %11 = vector.shape_cast %8 : vector<1x8x128xf32> to vector<1x1x8x128xf32>
      tpu.vector_store %arg4[%c0, %c0_3, %c0_4, %c0_5], %11 {strides = array<i32>} : memref<1x1x8x128xf32, #tpu.memory_space<vmem>>, vector<1x1x8x128xf32>,
      %cst_6 = arith.constant 0.000000e+00 : f32
      %12 = vector.broadcast %cst_6 : f32 to vector<1x8x128xf32>
      %c0_7 = arith.constant 0 : index
      %c0_8 = arith.constant 0 : index
      %c0_9 = arith.constant 0 : index
      %c0_10 = arith.constant 0 : index
      %13 = vector.load %arg5[%c0_7, %c0_8, %c0_9, %c0_10] : memref<1x1x8x128xf32, #tpu.memory_space<vmem>>, vector<1x1x8x128xf32>
      %14 = vector.shape_cast %13 : vector<1x1x8x128xf32> to vector<1x8x128xf32>
      %15 = vector.shape_cast %12 : vector<1x8x128xf32> to vector<1x1x8x128xf32>
      tpu.vector_store %arg5[%c0_7, %c0_8, %c0_9, %c0_10], %15 {strides = array<i32>} : memref<1x1x8x128xf32, #tpu.memory_space<vmem>>, vector<1x1x8x128xf32>,
      %cst_11 = arith.constant 0.000000e+00 : f32
      %16 = vector.broadcast %cst_11 : f32 to vector<8x128xf32>
      %c0_12 = arith.constant 0 : index
      %c0_13 = arith.constant 0 : index
      %c0_14 = arith.constant 0 : index
      %17 = vector.load %arg6[%c0_12, %c0_13, %c0_14] : memref<1x8x128xf32, #tpu.memory_space<vmem>>, vector<1x8x128xf32>
      %18 = vector.shape_cast %17 : vector<1x8x128xf32> to vector<8x128xf32>
      %19 = vector.shape_cast %16 : vector<8x128xf32> to vector<1x8x128xf32>
      tpu.vector_store %arg6[%c0_12, %c0_13, %c0_14], %19 {strides = array<i32>} : memref<1x8x128xf32, #tpu.memory_space<vmem>>, vector<1x8x128xf32>,
    } else {
    }
    %c1_i32_1 = arith.constant 1 : i32
    %5 = arith.cmpi slt, %1, %c1_i32_1 : i32
    %6 = arith.extui %5 : i1 to i32
    %c0_i32_2 = arith.constant 0 : i32
    %7 = arith.cmpi ne, %6, %c0_i32_2 : i32
    scf.if %7 {
      %c0 = arith.constant 0 : index
      %c0_3 = arith.constant 0 : index
      %8 = vector.load %arg3[%c0, %c0_3] : memref<16x128xf32, #tpu.memory_space<vmem>>, vector<16x128xf32>
      %c0_4 = arith.constant 0 : index
      %c0_5 = arith.constant 0 : index
      %c0_6 = arith.constant 0 : index
      %9 = vector.load %arg6[%c0_4, %c0_5, %c0_6] : memref<1x8x128xf32, #tpu.memory_space<vmem>>, vector<1x8x128xf32>
      %10 = vector.shape_cast %9 : vector<1x8x128xf32> to vector<8x128xf32>
      %11 = vector.shape_cast %8 : vector<16x128xf32> to vector<2x8x128xf32>
      %cst = arith.constant dense<0.000000e+00> : vector<8x128xf32>
      %12 = vector.multi_reduction <add>, %11, %cst [0] : vector<2x8x128xf32> to vector<8x128xf32>
      %13 = arith.addf %10, %12 : vector<8x128xf32>
      %c0_7 = arith.constant 0 : index
      %c0_8 = arith.constant 0 : index
      %c0_9 = arith.constant 0 : index
      %14 = vector.load %arg6[%c0_7, %c0_8, %c0_9] : memref<1x8x128xf32, #tpu.memory_space<vmem>>, vector<1x8x128xf32>
      %15 = vector.shape_cast %14 : vector<1x8x128xf32> to vector<8x128xf32>
      %16 = vector.shape_cast %13 : vector<8x128xf32> to vector<1x8x128xf32>
      tpu.vector_store %arg6[%c0_7, %c0_8, %c0_9], %16 {strides = array<i32>} : memref<1x8x128xf32, #tpu.memory_space<vmem>>, vector<1x8x128xf32>,
      %c0_10 = arith.constant 0 : index
      %c0_11 = arith.constant 0 : index
      %17 = vector.load %arg2[%c0_10, %c0_11] : memref<16x128xf32, #tpu.memory_space<vmem>>, vector<16x128xf32>
      %c0_12 = arith.constant 0 : index
      %c0_13 = arith.constant 0 : index
      %c0_14 = arith.constant 0 : index
      %c0_15 = arith.constant 0 : index
      %18 = vector.load %arg4[%c0_12, %c0_13, %c0_14, %c0_15] : memref<1x1x8x128xf32, #tpu.memory_space<vmem>>, vector<1x1x8x128xf32>
      %19 = vector.shape_cast %18 : vector<1x1x8x128xf32> to vector<8x128xf32>
      %20 = arith.mulf %17, %8 : vector<16x128xf32>
      %21 = vector.shape_cast %20 : vector<16x128xf32> to vector<2x8x128xf32>
      %cst_16 = arith.constant dense<0.000000e+00> : vector<8x128xf32>
      %22 = vector.multi_reduction <add>, %21, %cst_16 [0] : vector<2x8x128xf32> to vector<8x128xf32>
      %23 = arith.addf %19, %22 : vector<8x128xf32>
      %c0_17 = arith.constant 0 : index
      %c0_18 = arith.constant 0 : index
      %c0_19 = arith.constant 0 : index
      %c0_20 = arith.constant 0 : index
      %24 = vector.load %arg4[%c0_17, %c0_18, %c0_19, %c0_20] : memref<1x1x8x128xf32, #tpu.memory_space<vmem>>, vector<1x1x8x128xf32>
      %25 = vector.shape_cast %24 : vector<1x1x8x128xf32> to vector<8x128xf32>
      %26 = vector.shape_cast %23 : vector<8x128xf32> to vector<1x1x8x128xf32>
      tpu.vector_store %arg4[%c0_17, %c0_18, %c0_19, %c0_20], %26 {strides = array<i32>} : memref<1x1x8x128xf32, #tpu.memory_space<vmem>>, vector<1x1x8x128xf32>,
      %c0_21 = arith.constant 0 : index
      %c0_22 = arith.constant 0 : index
      %c0_23 = arith.constant 0 : index
      %c0_24 = arith.constant 0 : index
      %27 = vector.load %arg5[%c0_21, %c0_22, %c0_23, %c0_24] : memref<1x1x8x128xf32, #tpu.memory_space<vmem>>, vector<1x1x8x128xf32>
      %28 = vector.shape_cast %27 : vector<1x1x8x128xf32> to vector<8x128xf32>
      %29 = vector.shape_cast %17 : vector<16x128xf32> to vector<2x8x128xf32>
      %cst_25 = arith.constant dense<0.000000e+00> : vector<8x128xf32>
      %30 = vector.multi_reduction <add>, %29, %cst_25 [0] : vector<2x8x128xf32> to vector<8x128xf32>
      %31 = arith.addf %28, %30 : vector<8x128xf32>
      %c0_26 = arith.constant 0 : index
      %c0_27 = arith.constant 0 : index
      %c0_28 = arith.constant 0 : index
      %c0_29 = arith.constant 0 : index
      %32 = vector.load %arg5[%c0_26, %c0_27, %c0_28, %c0_29] : memref<1x1x8x128xf32, #tpu.memory_space<vmem>>, vector<1x1x8x128xf32>
      %33 = vector.shape_cast %32 : vector<1x1x8x128xf32> to vector<8x128xf32>
      %34 = vector.shape_cast %31 : vector<8x128xf32> to vector<1x1x8x128xf32>
      tpu.vector_store %arg5[%c0_26, %c0_27, %c0_28, %c0_29], %34 {strides = array<i32>} : memref<1x1x8x128xf32, #tpu.memory_space<vmem>>, vector<1x1x8x128xf32>,
    } else {
    }
    return
  }
  func.func @transform_0(%arg0: i32, %arg1: i32) -> (i32, i32) {
    %c1_i32 = arith.constant 1 : i32
    %0 = arith.muli %arg0, %c1_i32 : i32
    %1 = arith.addi %0, %arg1 : i32
    %c0_i32 = arith.constant 0 : i32
    %2 = arith.minsi %1, %c0_i32 : i32
    %c0_i32_0 = arith.constant 0 : i32
    %c0_i32_1 = arith.constant 0 : i32
    return %2, %c0_i32_0 : i32, i32
  }
  func.func @transform_1(%arg0: i32, %arg1: i32) -> (i32, i32) {
    %c1_i32 = arith.constant 1 : i32
    %0 = arith.muli %arg0, %c1_i32 : i32
    %1 = arith.addi %0, %arg1 : i32
    %c0_i32 = arith.constant 0 : i32
    %2 = arith.minsi %1, %c0_i32 : i32
    %c0_i32_0 = arith.constant 0 : i32
    %c0_i32_1 = arith.constant 0 : i32
    return %2, %c0_i32_0 : i32, i32
  }
  func.func @transform_2(%arg0: i32, %arg1: i32) -> (i32, i32, i32, i32) {
    %c0_i32 = arith.constant 0 : i32
    %c0_i32_0 = arith.constant 0 : i32
    %c0_i32_1 = arith.constant 0 : i32
    %c0_i32_2 = arith.constant 0 : i32
    return %arg0, %c0_i32, %c0_i32_0, %c0_i32_1 : i32, i32, i32, i32
  }
  func.func @transform_3(%arg0: i32, %arg1: i32) -> (i32, i32, i32, i32) {
    %c0_i32 = arith.constant 0 : i32
    %c0_i32_0 = arith.constant 0 : i32
    %c0_i32_1 = arith.constant 0 : i32
    %c0_i32_2 = arith.constant 0 : i32
    return %arg0, %c0_i32, %c0_i32_0, %c0_i32_1 : i32, i32, i32, i32
  }
  func.func @transform_4(%arg0: i32, %arg1: i32) -> (i32, i32, i32) {
    %c0_i32 = arith.constant 0 : i32
    %c0_i32_0 = arith.constant 0 : i32
    %c0_i32_1 = arith.constant 0 : i32
    return %arg0, %c0_i32, %c0_i32_0 : i32, i32, i32
  }
}

</mosaic_0001>

<bundles_post_ra>
// kernel: tpu_custom_call.1
= control target key start
LH: loop header
LB: loop body
LE: loop exit
PB: predicated region body
PF: predicated region fallthrough
CT: control target
= control target key end

     0   :  { %10 = vsyncpa [#allocation3], 0  ;;  %s1243_s0 = inlined_call_operand.hbm [shape: f32[16,128], index: 0, kind: input, shape index: {}]   ;;  %s1244_s1 = inlined_call_operand.hbm [shape: f32[16,128], index: 1, kind: input, shape index: {}]   ;;  %s1245_s2 = inlined_call_operand.hbm [shape: f32[2,1,8,128], index: 2, kind: output, shape index: {0}]   ;;  %s1246_s3 = inlined_call_operand.hbm [shape: f32[2,1,8,128], index: 3, kind: output, shape index: {1}]   ;;  %s1247_s4 = inlined_call_operand.hbm [shape: f32[2,8,128], index: 4, kind: output, shape index: {2}]  }
   0x1   :  { %12 = vsyncpa [#allocation3 + $0x1], 0 }
   0x2   :  { %13 = vsyncpa [#allocation6], 0 }
   0x3   :  { %15 = vsyncpa [#allocation6 + $0x1], 0 }
   0x4   :  { %16 = vsyncpa [#allocation4], 0 }
   0x5   :  { %18 = vsyncpa [#allocation4 + $0x1], 0 }
   0x6   :  { %19 = vsyncpa [#allocation9], 0 }
   0x7   :  { %21 = vsyncpa [#allocation9 + $0x1], 0  ;;  %s947_s15 = smov 0   ;;  %s949_s16 = smov 0  }
   0x8   :  { %s951_s17 = smov 0   ;;  %s953_s18 = smov 0  }
   0x9   :  { %s955_s19 = smov 0   ;;  %s957_s20 = smov 0  }
   0xa   :  { %s959_s21 = smov 0   ;;  %s961_s22 = smov 0  }
   0xb LB: > { %s986_s23 = sadd.s32 4294967295, %s912_s22   ;;  %s1250_s24 = sadd.s32 4294967294, %s912_s22   ;;  %s912_s22 = sphi %s961_s22, %s27_s22   ;;  %s908_s21 = sphi %s959_s21, %s1271_s21   ;;  %s904_s20 = sphi %s957_s20, %s1270_s20   ;;  %s900_s19 = sphi %s955_s19, %s1233_s19   ;;  %s896_s18 = sphi %s953_s18, %s1269_s18   ;;  %s892_s17 = sphi %s951_s17, %s1268_s17   ;;  %s888_s16 = sphi %s949_s16, %s1267_s16   ;;  %s884_s15 = sphi %s947_s15, %s1266_s15  }
   0xc   : > { %s39_s25 = sadd.s32 1, %s908_s21  ;;  %p881_p1 = scmp.ne.s32.totalorder %s900_s19, 0 }
   0xd   : > { %p41_p0 = scmp.ge.s32.totalorder %s39_s25, 2  ;;  %p60_p2 = scmp.eq.s32.totalorder %s912_s22, 0 }
   0xe   : > { %p65_p3 = scmp.ne.s32.totalorder %s900_s19, %s896_s18  ;;  %p66_p5 = scmp.eq.s32.totalorder %s986_s23, 0 }
   0xf   : > { %s1273_s25 = smov (%p41_p0, %s39_s25), 0  ;;  %p995_p4 = por %p881_p1, %p60_p2 }
  0x10   : > { %1252 = sst [smem:[#allocation15_spill]] %s1273_s25  ;;  %p1000_p6 = por %p66_p5, %p65_p3 }
  0x11   : > { %s107_s28 = ssub.s32 %s908_s21, %s1273_s25  ;;  %s110_s29 = sadd.s32 1, %s892_s17 }
  0x12   : > { %s1254_s27 = scalar_select %p1000_p6, 1, 0 }
  0x13   : > { %p108_p7 = scmp.eq.s32.totalorder %s107_s28, 0  ;;  %p120_p8 = scmp.ne.s32.totalorder %s892_s17, %s888_s16 }
  0x14   : > { %p121_p9 = scmp.eq.s32.totalorder %s986_s23, 1  ;;  %p126_p10 = scmp.ne.s32.totalorder %s888_s16, %s884_s15 }
  0x15   : > { %s1008_s30 = scalar_select %p108_p7, %s892_s17, %s110_s29  }
  0x16   : > { %p127_p11 = scmp.eq.s32.totalorder %s1250_s24, 1  ;;  %p1017_p12 = por %p121_p9, %p120_p8 }
  0x17   : > { %p608_p1 = scmp.lt.s32.totalorder %s912_s22, 2  ;;  %s914_s7 = smov [#allocation2]  }
  0x18   : > { %s1255_s5 = scalar_select %p1017_p12, 1, 0 }
  0x19   : > { %p1022_p0 = por %p127_p11, %p126_p10  ;;  %s213_s8 = sshll.u32 %s914_s7, 4  ;;  %s214_s8 = int_to_ptr.vmem [resolvable:$true] %s213_s8 }
  0x1a   : > { %p1029_p2 = pnand %p608_p1, %p995_p4  ;;  %s685_s12 = scalar_lea.hbm %s1243_s0, 256 }
  0x1b   : > { %s1256_s6 = scalar_select %p1022_p0, 1, 0 }
  0x1c   : > { %p686_p3 = scmp.ne.s32.totalorder %s1243_s0, %s685_s12  ;;  %p687_p5 = pneg %p1029_p2 }
  0x1d   : > { %p692_p8 = scmp.lt.u32.totalorder %s685_s12, %s685_s12  ;;  %p694_p9 = scmp.lt.u32.totalorder %s685_s12, %s1243_s0 }
  0x1e   : > { %p688_p7 = pnand %p687_p5, %p686_p3 }
  0x1f   : > { %p695_p10 = por %p694_p9, %p692_p8 }
  0x20   : > { %p689_p4 = pneg %p688_p7 }
  0x22   : > { %p696_p11 = pnand %p695_p10, %p689_p4 }
  0x24   : > { %699 = shalt.err (!%p696_p11)
}
  0x25   : > { %s700_s28 = scalar_lea.vmem %s214_s8, 256  ;;  %s707_s29 = scalar_lea.vmem %s214_s8, 512 }
  0x26   : > { %p701_p1 = scmp.ne.s32.totalorder %s214_s8, %s700_s28  ;;  %p708_p12 = scmp.lt.s32.totalorder %s214_s8, %s214_s8 }
  0x27   : > { %p709_p6 = scmp.lt.s32.totalorder %s707_s29, %s700_s28 }
  0x28   : > { %p703_p13 = pnand %p701_p1, %p687_p5 }
  0x29   : > { %p710_p3 = por %p709_p6, %p708_p12 }
  0x2a   : > { %p704_p0 = pneg %p703_p13 }
  0x2c   : > { %p711_p7 = pnand %p710_p3, %p704_p0 }
  0x2e   : > { %714 = shalt.err (!%p711_p7)
}
  0x2f   : > { %s915_s7 = smov 128   ;;  %s916_s10 = smov 8  }
  0x30   : > { %594 = dma.hbm_to_vmem [thread:$0]  (!%p1029_p2), %s1243_s0, 256, %s214_s8, [#allocation3], %s915_s7, %s915_s7, %s916_s10  }
  0x31   : > { %p564_p13 = scmp.ge.s32.totalorder %s912_s22, 1  ;;  %p245_p4 = scmp.lt.s32.totalorder %s912_s22, 3 }
  0x32   : > { %s917_s14 = smov [#allocation5]   ;;  %s715_s29 = scalar_lea.hbm %s1244_s1, 256 }
  0x33   : > { %p1060_p8 = pnand %p564_p13, %p245_p4  ;;  %s237_s18 = sshll.u32 %s917_s14, 4  ;;  %s238_s18 = int_to_ptr.vmem [resolvable:$true] %s237_s18 }
  0x34   : > { %p716_p6 = scmp.ne.s32.totalorder %s1244_s1, %s715_s29  ;;  %p722_p9 = scmp.lt.u32.totalorder %s715_s29, %s715_s29 }
  0x35   : > { %s1258_s13 = scalar_select %p1060_p8, 1, 0 }
  0x36   : > { %p718_p12 = pnand %p716_p6, %p687_p5  ;;  %p724_p10 = scmp.lt.u32.totalorder %s715_s29, %s1244_s1 }
  0x38   : > { %p719_p0 = pneg %p718_p12  ;;  %p725_p11 = por %p724_p10, %p722_p9 }
  0x3a   : > { %p726_p1 = pnand %p725_p11, %p719_p0 }
  0x3c   : > { %729 = shalt.err (!%p726_p1)
}
  0x3d   : > { %s730_s12 = scalar_lea.vmem %s238_s18, 256  ;;  %s737_s24 = scalar_lea.vmem %s238_s18, 512 }
  0x3e   : > { %p731_p3 = scmp.ne.s32.totalorder %s238_s18, %s730_s12  ;;  %p738_p4 = scmp.lt.s32.totalorder %s238_s18, %s238_s18 }
  0x3f   : > { %p739_p8 = scmp.lt.s32.totalorder %s737_s24, %s730_s12 }
  0x40   : > { %p733_p7 = pnand %p731_p3, %p687_p5 }
  0x41   : > { %p740_p6 = por %p739_p8, %p738_p4 }
  0x42   : > { %p734_p13 = pneg %p733_p7 }
  0x44   : > { %p741_p12 = pnand %p740_p6, %p734_p13 }
  0x46   : > { %744 = shalt.err (!%p741_p12)
}
  0x47   : > { %597 = dma.hbm_to_vmem [thread:$0]  (!%p1029_p2), %s1244_s1, 256, %s238_s18, [#allocation6], %s915_s7, %s915_s7, %s916_s10  }
  0x48   : > { %p1259_p0 = scmp.ne.s32.totalorder %s1258_s13, 0 }
  0x49   : > { %s251_s26 = sand.u32 (!%p1259_p0), 1, %s900_s19   ;;  %p1260_p5 = scmp.ne.s32.totalorder (!%p1259_p0), %s1254_s27, 0 }
  0x4a   : > { %249 = sbr.rel (%p1259_p0) target bundleno = 171 (0xab), region = 28  ;;  %s565_s28 = sshll.u32 (!%p1259_p0), %s251_s26, 4 }
  0x4b   : > { %s252_s29 = scalar_lea.sflag (!%p1259_p0), [#allocation3], %s251_s26  ;;  %s255_s8 = scalar_lea.vmem (!%p1259_p0), [#allocation2], %s565_s28 }
  0x51   : > { %866 = dma.done.wait (%p1260_p5), %s252_s29, 256  }
  0x52   : > { %868 = vsyncadd (%p1260_p5), %s252_s29, 4294967040  ;;  %s261_s9 = scalar_lea.sflag [#allocation6], %s251_s26  ;;  %s264_s11 = scalar_lea.vmem [#allocation5], %s565_s28 }
  0x53   : > { %870 = dma.done.wait (%p1260_p5), %s261_s9, 256  }
  0x54   : > { %872 = vsyncadd (%p1260_p5), %s261_s9, 4294967040  ;;  %s287_s7 = sand.u32 1, %s888_s16   ;;  %v918_v0 = vmov 0.0   ;;  %p570_p2 = scmp.ge.s32.totalorder %s904_s20, 1 }
  0x55   : > { %s567_s10 = sshll.u32 %s287_s7, 3  ;;  %v324_v1 = vld [vmem:[%s264_s11] sm:$0xff] (!%p570_p2)  ;;  %v325_v2 = vld [vmem:[%s264_s11 + $0x8] sm:$0xff] (!%p570_p2) }
  0x56   : > { %s1101_s13 = scalar_lea.vmem [#allocation7], %s567_s10  ;;  %s1104_s18 = scalar_lea.vmem [#allocation8], %s567_s10  ;;  %v327_v4 = vadd.f32 (!%p570_p2), %v325_v2, %v324_v1  ;;  %v330_v5 = vld [vmem:[%s255_s8] sm:$0xff] (!%p570_p2)  ;;  %v331_v6 = vld [vmem:[%s255_s8 + $0x8] sm:$0xff] (!%p570_p2) }
  0x57   : > { %317 = vst [vmem:[%s1101_s13] sm:$0xff] %v918_v0  ;;  %318 = vst [vmem:[%s1104_s18] sm:$0xff] %v918_v0  ;;  %s1107_s12 = scalar_lea.vmem [#allocation10], %s567_s10  ;;  %323 = sbr.rel (%p570_p2) target bundleno = 99 (0x63), region = 44  ;;  %v333_v7 = vmul.f32 (!%p570_p2), %v330_v5, %v324_v1  ;;  %v334_v8 = vmul.f32 (!%p570_p2), %v331_v6, %v325_v2  ;;  %v339_v10 = vadd.f32 (!%p570_p2), %v331_v6, %v330_v5 }
  0x58   : > { %319 = vst [vmem:[%s1107_s12] sm:$0xff] %v918_v0 }
  0x59   : > { %v335_v13 = vadd.f32 (!%p570_p2), %v334_v8, %v333_v7 }
  0x5e   : > { %v338_v9 = vld [vmem:[%s1104_s18] sm:$0xff]  ;;  %v332_v12 = vld [vmem:[%s1101_s13] sm:$0xff] }
  0x5f   : > { %v326_v3 = vld [vmem:[%s1107_s12] sm:$0xff]  ;;  %v340_v14 = vadd.f32 %v339_v10, %v338_v9  ;;  %v336_v15 = vadd.f32 %v335_v13, %v332_v12 }
  0x60   : > { %v328_v11 = vadd.f32 %v327_v4, %v326_v3 }
  0x61   : > { %341 = vst [vmem:[%s1104_s18] sm:$0xff] %v340_v14  ;;  %337 = vst [vmem:[%s1101_s13] sm:$0xff] %v336_v15 }
  0x62   : > { %329 = vst [vmem:[%s1107_s12] sm:$0xff] %v328_v11 }
  0x63 PF: > { %s347_s27 = sand.u32 1, %s986_s23   ;;  %s1119_s24 = sshll.u32 %s904_s20, 7 }
  0x64   : > { %s1125_s26 = scalar_lea.hbm %s1246_s3, %s1119_s24  ;;  %s379_s28 = sshll.u32 %s1104_s18, 4  ;;  %s1128_s28 = int_to_ptr.vmem [resolvable:$true] %s379_s28 }
  0x65   : > { %s1134_s9 = scalar_lea.hbm %s1245_s2, %s1119_s24  ;;  %s1136_s20 = scalar_lea.sflag [#allocation9], %s347_s27 }
  0x66   : > { %s745_s23 = scalar_lea.vmem %s1128_s28, 128  ;;  %p1261_p9 = scmp.ne.s32.totalorder %s1255_s5, 0 }
  0x67   : > { %p746_p8 = scmp.ne.s32.totalorder %s1128_s28, %s745_s23  ;;  %s919_s11 = smov [#allocation8]  }
  0x68   : > { %s749_s10 = sshll.u32 %s919_s11, 4  ;;  %s750_s10 = int_to_ptr.vmem [resolvable:$false] %s749_s10 }
  0x69   : > { %p747_p10 = pnand %p746_p8, %p1261_p9  ;;  %s751_s18 = scalar_lea.vmem %s750_s10, 256 }
  0x6a   : > { %p752_p1 = scmp.lt.s32.totalorder %s1128_s28, %s750_s10  ;;  %p753_p3 = scmp.lt.s32.totalorder %s751_s18, %s745_s23 }
  0x6b   : > { %p748_p11 = pneg %p747_p10 }
  0x6c   : > { %p754_p7 = por %p753_p3, %p752_p1 }
  0x6e   : > { %p755_p13 = pnand %p754_p7, %p748_p11 }
  0x70   : > { %758 = shalt.err (!%p755_p13)
}
  0x71   : > { %s759_s27 = scalar_lea.hbm %s1125_s26, 128  ;;  %s763_s29 = scalar_lea.hbm %s1246_s3, 256 }
  0x72   : > { %p760_p4 = scmp.ne.s32.totalorder %s1125_s26, %s759_s27  ;;  %p764_p0 = scmp.lt.u32.totalorder %s1125_s26, %s1246_s3 }
  0x73   : > { %p765_p5 = scmp.lt.u32.totalorder %s763_s29, %s759_s27  ;;  %p767_p8 = scmp.lt.u32.totalorder %s759_s27, %s1125_s26 }
  0x74   : > { %p761_p6 = pnand %p760_p4, %p1261_p9 }
  0x75   : > { %p766_p2 = por %p765_p5, %p764_p0 }
  0x76   : > { %p762_p12 = pneg %p761_p6 }
  0x77   : > { %p768_p10 = por %p767_p8, %p766_p2 }
  0x79   : > { %p769_p11 = pnand %p768_p10, %p762_p12 }
  0x7b   : > { %772 = shalt.err (!%p769_p11)
}
  0x7c   : > { %586 = dma.vmem_to_hbm [thread:$0]  (%p1261_p9), %s1128_s28, 128, %s1125_s26, %s1136_s20  }
  0x7d   : > { %s366_s23 = sshll.u32 %s1101_s13, 4  ;;  %s1165_s25 = scalar_lea.hbm %s1247_s4, %s1119_s24  ;;  %s1167_s23 = int_to_ptr.vmem [resolvable:$true] %s366_s23 }
  0x7e   : > { %s392_s27 = sshll.u32 %s1107_s12, 4  ;;  %s343_s14 = scalar_lea.sflag [#allocation4], %s287_s7  ;;  %s393_s27 = int_to_ptr.vmem [resolvable:$true] %s392_s27 }
  0x7f   : > { %s773_s29 = scalar_lea.vmem %s1167_s23, 128  ;;  %s920_s26 = smov [#allocation7]  }
  0x80   : > { %p774_p1 = scmp.ne.s32.totalorder %s1167_s23, %s773_s29  ;;  %s777_s13 = sshll.u32 %s920_s26, 4  ;;  %s778_s13 = int_to_ptr.vmem [resolvable:$false] %s777_s13 }
  0x81   : > { %s779_s28 = scalar_lea.vmem %s778_s13, 256  ;;  %p780_p13 = scmp.lt.s32.totalorder %s1167_s23, %s778_s13 }
  0x82   : > { %p775_p3 = pnand %p774_p1, %p1261_p9  ;;  %p781_p4 = scmp.lt.s32.totalorder %s779_s28, %s773_s29 }
  0x84   : > { %p776_p7 = pneg %p775_p3  ;;  %p782_p6 = por %p781_p4, %p780_p13 }
  0x86   : > { %p783_p12 = pnand %p782_p6, %p776_p7 }
  0x88   : > { %786 = shalt.err (!%p783_p12)
}
  0x89   : > { %s787_s7 = scalar_lea.hbm %s1134_s9, 128  ;;  %s791_s11 = scalar_lea.hbm %s1245_s2, 256 }
  0x8a   : > { %p788_p0 = scmp.ne.s32.totalorder %s1134_s9, %s787_s7  ;;  %p792_p8 = scmp.lt.u32.totalorder %s1134_s9, %s1245_s2 }
  0x8b   : > { %p793_p10 = scmp.lt.u32.totalorder %s791_s11, %s787_s7  ;;  %p795_p1 = scmp.lt.u32.totalorder %s787_s7, %s1134_s9 }
  0x8c   : > { %p789_p5 = pnand %p788_p0, %p1261_p9 }
  0x8d   : > { %p794_p11 = por %p793_p10, %p792_p8 }
  0x8e   : > { %p790_p2 = pneg %p789_p5 }
  0x8f   : > { %p796_p3 = por %p795_p1, %p794_p11 }
  0x91   : > { %p797_p7 = pnand %p796_p3, %p790_p2 }
  0x93   : > { %800 = shalt.err (!%p797_p7)
}
  0x94   : > { %585 = dma.vmem_to_hbm [thread:$0]  (%p1261_p9), %s1167_s23, 128, %s1134_s9, %s343_s14  }
  0x95   : > { %s801_s29 = scalar_lea.vmem %s393_s27, 128  ;;  %s921_s26 = smov [#allocation10]  }
  0x96   : > { %p802_p13 = scmp.ne.s32.totalorder %s393_s27, %s801_s29  ;;  %s805_s13 = sshll.u32 %s921_s26, 4  ;;  %s806_s13 = int_to_ptr.vmem [resolvable:$false] %s805_s13 }
  0x97   : > { %s807_s28 = scalar_lea.vmem %s806_s13, 256  ;;  %p808_p12 = scmp.lt.s32.totalorder %s393_s27, %s806_s13 }
  0x98   : > { %p803_p4 = pnand %p802_p13, %p1261_p9  ;;  %p809_p0 = scmp.lt.s32.totalorder %s807_s28, %s801_s29 }
  0x9a   : > { %p804_p6 = pneg %p803_p4  ;;  %p810_p5 = por %p809_p0, %p808_p12 }
  0x9c   : > { %p811_p2 = pnand %p810_p5, %p804_p6 }
  0x9e   : > { %814 = shalt.err (!%p811_p2)
}
  0x9f   : > { %s815_s12 = scalar_lea.hbm %s1165_s25, 128  ;;  %s819_s14 = scalar_lea.hbm %s1247_s4, 256 }
  0xa0   : > { %p816_p8 = scmp.ne.s32.totalorder %s1165_s25, %s815_s12  ;;  %p820_p1 = scmp.lt.u32.totalorder %s1165_s25, %s1247_s4 }
  0xa1   : > { %p821_p3 = scmp.lt.u32.totalorder %s819_s14, %s815_s12  ;;  %p823_p13 = scmp.lt.u32.totalorder %s815_s12, %s1165_s25 }
  0xa2   : > { %p817_p10 = pnand %p816_p8, %p1261_p9 }
  0xa3   : > { %p822_p7 = por %p821_p3, %p820_p1 }
  0xa4   : > { %p818_p11 = pneg %p817_p10 }
  0xa5   : > { %p824_p4 = por %p823_p13, %p822_p7 }
  0xa7   : > { %p825_p6 = pnand %p824_p4, %p818_p11 }
  0xa9   : > { %828 = shalt.err (!%p825_p6)
}
  0xaa   : > { %587 = dma.vmem_to_hbm [thread:$0]  (%p1261_p9), %s393_s27, 128, %s1165_s25, %s1136_s20  }
  0xab PF: > { %s404_s8 = sand.u32 1, %s884_s15   ;;  %p1262_p12 = scmp.ne.s32.totalorder %s1256_s6, 0 }
  0xac   : > { %p1263_p0 = scmp.ge.s32.totalorder %s912_s22, 2  ;;  %s405_s11 = scalar_lea.sflag [#allocation4], %s404_s8 }
  0xae   : > { %p599_p5 = pnand %p1263_p0, %p1262_p12 }
  0xb0   : > { %874 = dma.done.wait (!%p599_p5), %s405_s11, 128  }
  0xb1   : > { %876 = vsyncadd (!%p599_p5), %s405_s11, 4294967168  ;;  %s1264_s10 = sadd.s32 4294967294, %s912_s22  }
  0xb2   : > { %s413_s18 = sand.u32 1, %s1264_s10  }
  0xb3   : > { %s414_s29 = scalar_lea.sflag [#allocation9], %s413_s18 }
  0xb4   : > { %878 = dma.done.wait (!%p599_p5), %s414_s29, 256  }
  0xb5   : > { %880 = vsyncadd (!%p599_p5), %s414_s29, 4294967040  ;;  %s27_s22 = sadd.s32 1, %s912_s22   ;;  %s1265_s5 = sld [smem:[#allocation15_spill]] }
  0xb6   : > { %p24_p9 = scmp.ge.s32.totalorder %s27_s22, 4   ;;  %s1266_s15 = smov %s888_s16 }
  0xb7   : > { %s1267_s16 = smov %s892_s17  ;;  %s1268_s17 = smov %s1008_s30 }
  0xb8   : > { %s1269_s18 = smov %s900_s19  ;;  %s1233_s19 = smov 0  }
  0xb9   : > { %s1270_s20 = smov %s908_s21  ;;  %26 = sbr.rel (!%p24_p9) target bundleno = 11 (0xb), region = 126 }
  0xbb   : > { %s1271_s21 = smov %s1265_s5 }
  0xc0   :  { %428 = vsyncpa [#allocation3], 1 }
  0xc1   :  { %430 = vsyncpa [#allocation3 + $0x1], 1 }
  0xc2   :  { %431 = vsyncpa [#allocation6], 1 }
  0xc3   :  { %433 = vsyncpa [#allocation6 + $0x1], 1 }
  0xc4   :  { %434 = vsyncpa [#allocation4], 1 }
  0xc5   :  { %436 = vsyncpa [#allocation4 + $0x1], 1 }
  0xc6   :  { %437 = vsyncpa [#allocation9], 1 }
  0xc7   :  { %439 = vsyncpa [#allocation9 + $0x1], 1 }

</bundles_post_ra>
